<compile_context>
chip_gen: v7x
topology: tpu7x:2x2x1
jax: 0.10.0
libtpu: 0.0.40
codegen_flags: <defaults>
</compile_context>

<pallas_src>
import functools

import jax
import jax.numpy as jnp
from jax.experimental import pallas as pl
from jax.experimental.pallas import tpu as pltpu


def _round_up(x: int, m: int) -> int:
    return ((x + m - 1) // m) * m


def _pick_tile(dim: int, align: int, max_tile: int):
    """Pick (tile, padded_dim) for one dimension.

    * If the 'align'-rounded dim fits in max_tile, use it as one full tile
      (zero grid overhead, minimal padding).
    * Otherwise scan align-multiples <= max_tile and pick the largest tile
      whose padding is within ~12.5% of the minimal achievable padding
      (large tiles amortize per-step overhead / accumulator RMW).
    """
    padded0 = _round_up(dim, align)
    if padded0 <= max_tile:
        return padded0, padded0

    candidates = []
    t = (max_tile // align) * align
    while t >= align:
        candidates.append((t, _round_up(dim, t)))
        t -= align
    min_padded = min(p for _, p in candidates)
    threshold = min_padded + max(min_padded // 8, align)
    for t, p in candidates:                       # largest tile first
        if p <= threshold:
            return t, p
    return candidates[-1]                         # unreachable fallback


def linear_kernel(x_ref, w_ref, b_ref, o_ref):
    """One (i, j, k) grid step.

    Accumulates directly into o_ref (f32, VMEM-resident across the whole k
    reduction because the output block index is constant in k); bias is added
    exactly once at the last k step.
    """
    k = pl.program_id(2)
    part = jnp.dot(x_ref[...], w_ref[...], preferred_element_type=jnp.float32)

    @pl.when(k == 0)
    def _init():
        o_ref[...] = part

    @pl.when(k != 0)
    def _accumulate():
        o_ref[...] += part

    @pl.when(k == pl.num_programs(2) - 1)
    def _add_bias():
        o_ref[...] += b_ref[...]          # (1, tn) broadcast over tm rows


@functools.partial(
    jax.jit, static_argnames=("out_features", "tm", "tn", "tk", "Mp"))
def _linear_forward(x, w_p, b_p, *, out_features, tm, tn, tk, Mp):
    """y = x @ Wt + b with pre-padded Wt [Kp, Np] and bias [1, Np]."""
    B, In = x.shape
    Kp, Np = w_p.shape

    # Only x needs per-call padding (weights/bias were padded once at setup).
    x_p = x if (Mp, Kp) == (B, In) else jnp.pad(x, ((0, Mp - B), (0, Kp - In)))

    grid = (Mp // tm, Np // tn, Kp // tk)

    cost = pl.CostEstimate(
        flops=2 * Mp * Np * Kp,
        transcendentals=0,
        bytes_accessed=4 * (Mp * Kp * grid[1] + Kp * Np * grid[0]
                            + Mp * Np + Np))

    out_p = pl.pallas_call(
        linear_kernel,
        out_shape=jax.ShapeDtypeStruct((Mp, Np), jnp.float32),
        grid_spec=pltpu.PrefetchScalarGridSpec(
            num_scalar_prefetch=0,
            grid=grid,
            in_specs=[
                pl.BlockSpec((tm, tk), lambda i, j, k: (i, k)),   # x tile
                pl.BlockSpec((tk, tn), lambda i, j, k: (k, j)),   # Wt tile
                pl.BlockSpec((1, tn), lambda i, j, k: (0, j)),    # bias slab
            ],
            out_specs=pl.BlockSpec((tm, tn), lambda i, j, k: (i, j)),
        ),
        compiler_params=pltpu.CompilerParams(
            # M/N parallel (megacore sharding on v7x), K is the reduction.
            dimension_semantics=("parallel", "parallel", "arbitrary"),
        ),
        cost_estimate=cost,
    )(x_p, w_p, b_p)

    return out_p[:B, :out_features]


class PallasLinear:
    """Forward-only equivalent of the PyTorch Linear module.

    Weight transpose + padding and the N/K tile choice happen ONCE here
    (parameter setup), not in the per-call path.
    """

    def __init__(self, W, b, *, max_tm: int = 512, max_tn: int = 512,
                 max_tk: int = 1024):
        Out, In = W.shape
        assert b.shape == (Out,), "b must be [output_size]"
        self.in_features = In
        self.out_features = Out
        self.max_tm = max_tm

        # Lane dims (N, K) must be multiples of 128 -> lane-dense, unmasked vst.
        self.tn, self.Np = _pick_tile(Out, 128, max_tn)
        self.tk, self.Kp = _pick_tile(In, 128, max_tk)

        # One-time layout plumbing: W.T padded to [Kp, Np], bias to [1, Np].
        Wt = jnp.asarray(W, dtype=jnp.float32).T                 # [In, Out]
        self.w_p = (Wt if (self.Kp, self.Np) == (In, Out) else
                    jnp.pad(Wt, ((0, self.Kp - In), (0, self.Np - Out))))
        b2d = jnp.asarray(b, dtype=jnp.float32).reshape(1, Out)
        self.b_p = (b2d if self.Np == Out else
                    jnp.pad(b2d, ((0, 0), (0, self.Np - Out))))

    def __call__(self, x):
        B = x.shape[0]
        assert x.shape[1] == self.in_features
        tm, Mp = _pick_tile(B, 8, self.max_tm)
        tn = self.tn

        # v7x has 2 TensorCores: make sure the parallel grid axes have >=2
        # blocks when the problem allows it, else one core sits idle.
        if (Mp // tm) * (self.Np // tn) == 1:
            if Mp >= 16:
                tm = _round_up((Mp + 1) // 2, 8)     # split M (no W re-pad)
                Mp = 2 * tm
            else:
                nblk = self.Np // 128
                if nblk >= 2:                         # split N within padded Np
                    d = max(d for d in range(1, nblk) if nblk % d == 0)
                    tn = 128 * d

        return _linear_forward(x, self.w_p, self.b_p,
                               out_features=self.out_features,
                               tm=tm, tn=tn, tk=self.tk, Mp=Mp)


if __name__ == "__main__":
    key = jax.random.PRNGKey(0)

    def run_case(batch_size, input_size, output_size, k, **layer_kwargs):
        kx, kw = jax.random.split(k)
        # Mirror module init: W ~ N(0,1), b = 0.
        x = jax.random.normal(kx, (batch_size, input_size), dtype=jnp.float32)
        W = jax.random.normal(kw, (output_size, input_size), dtype=jnp.float32)
        b = jnp.zeros((output_size,), dtype=jnp.float32)

        layer = PallasLinear(W, b, **layer_kwargs)
        y = jax.block_until_ready(layer(x))

        y_ref = jnp.dot(x, W.T, precision=jax.lax.Precision.HIGHEST) + b
        assert y.shape == (batch_size, output_size)
        assert jnp.allclose(y, y_ref, atol=1e-3, rtol=1e-3), (
            f"mismatch for ({batch_size},{input_size},{output_size}): "
            f"max abs err {jnp.max(jnp.abs(y - y_ref))}")

    k1, k2, k3 = jax.random.split(key, 3)
    # Small shape matching the module's typical use (single grid cell).
    run_case(batch_size=8, input_size=32, output_size=16, k=k1)
    # Non-aligned medium shape: tight padding (304x640x384), no K grid axis,
    # M split into 2 parallel blocks for megacore.
    run_case(batch_size=300, input_size=520, output_size=260, k=k2)
    # Force a multi-step K reduction (tk capped at 128 -> 5 k steps) to
    # exercise the accumulate-into-o_ref path.
    run_case(batch_size=64, input_size=520, output_size=260, k=k3, max_tk=128)

    print("KERNEL_OK")
</pallas_src>

<mosaic_0001>
module attributes {stable_mosaic.version = 11 : i64} {
  func.func @linear_kernel(%arg0: i32, %arg1: i32, %arg2: i32, %arg3: memref<8x128xf32, #tpu.memory_space<vmem>>, %arg4: memref<128x128xf32, #tpu.memory_space<vmem>>, %arg5: memref<1x128xf32, #tpu.memory_space<vmem>>, %arg6: memref<8x128xf32, #tpu.memory_space<vmem>>) attributes {dimension_semantics = [#tpu.dimension_semantics<parallel>, #tpu.dimension_semantics<parallel>, #tpu.dimension_semantics<arbitrary>], iteration_bounds = array<i64: 1, 1, 1>, scalar_prefetch = 0 : i64, scratch_operands = 0 : i64, tpu.core_type = #tpu.core_type<tc>, window_params = [{transform_indices = @transform_0, window_bounds = array<i64: 8, 128>}, {transform_indices = @transform_1, window_bounds = array<i64: 128, 128>}, {transform_indices = @transform_2, window_bounds = array<i64: 1, 128>}, {transform_indices = @transform_3, window_bounds = array<i64: 8, 128>}]} {
    %c0 = arith.constant 0 : index
    %c0_0 = arith.constant 0 : index
    %0 = vector.load %arg3[%c0, %c0_0] : memref<8x128xf32, #tpu.memory_space<vmem>>, vector<8x128xf32>
    %c0_1 = arith.constant 0 : index
    %c0_2 = arith.constant 0 : index
    %1 = vector.load %arg4[%c0_1, %c0_2] : memref<128x128xf32, #tpu.memory_space<vmem>>, vector<128x128xf32>
    %cst = arith.constant dense<0.000000e+00> : vector<8x128xf32>
    %2 = tpu.matmul %0, %1, %cst {dimension_numbers = #tpu.dot_dimension_numbers<[1], [0], [0], [1], [0, 0, 1, 1], [], []>} : vector<8x128xf32>, vector<128x128xf32>, vector<8x128xf32> -> vector<8x128xf32>
    %c0_i32 = arith.constant 0 : i32
    %3 = arith.cmpi eq, %arg2, %c0_i32 : i32
    %4 = arith.extui %3 : i1 to i32
    %c0_i32_3 = arith.constant 0 : i32
    %5 = arith.cmpi ne, %4, %c0_i32_3 : i32
    scf.if %5 {
      %c0_8 = arith.constant 0 : index
      %c0_9 = arith.constant 0 : index
      %12 = vector.load %arg6[%c0_8, %c0_9] : memref<8x128xf32, #tpu.memory_space<vmem>>, vector<8x128xf32>
      tpu.vector_store %arg6[%c0_8, %c0_9], %2 {strides = array<i32>} : memref<8x128xf32, #tpu.memory_space<vmem>>, vector<8x128xf32>,
    } else {
    }
    %c0_i32_4 = arith.constant 0 : i32
    %6 = arith.cmpi ne, %arg2, %c0_i32_4 : i32
    %7 = arith.extui %6 : i1 to i32
    %c0_i32_5 = arith.constant 0 : i32
    %8 = arith.cmpi ne, %7, %c0_i32_5 : i32
    scf.if %8 {
      %c0_8 = arith.constant 0 : index
      %c0_9 = arith.constant 0 : index
      %12 = vector.load %arg6[%c0_8, %c0_9] : memref<8x128xf32, #tpu.memory_space<vmem>>, vector<8x128xf32>
      %13 = arith.addf %12, %2 : vector<8x128xf32>
      %c0_10 = arith.constant 0 : index
      %c0_11 = arith.constant 0 : index
      %14 = vector.load %arg6[%c0_10, %c0_11] : memref<8x128xf32, #tpu.memory_space<vmem>>, vector<8x128xf32>
      tpu.vector_store %arg6[%c0_10, %c0_11], %13 {strides = array<i32>} : memref<8x128xf32, #tpu.memory_space<vmem>>, vector<8x128xf32>,
    } else {
    }
    %c0_i32_6 = arith.constant 0 : i32
    %9 = arith.cmpi eq, %arg2, %c0_i32_6 : i32
    %10 = arith.extui %9 : i1 to i32
    %c0_i32_7 = arith.constant 0 : i32
    %11 = arith.cmpi ne, %10, %c0_i32_7 : i32
    scf.if %11 {
      %c0_8 = arith.constant 0 : index
      %c0_9 = arith.constant 0 : index
      %12 = vector.load %arg6[%c0_8, %c0_9] : memref<8x128xf32, #tpu.memory_space<vmem>>, vector<8x128xf32>
      %c0_10 = arith.constant 0 : index
      %c0_11 = arith.constant 0 : index
      %13 = vector.load %arg5[%c0_10, %c0_11] : memref<1x128xf32, #tpu.memory_space<vmem>>, vector<1x128xf32>
      %14 = vector.broadcast %13 : vector<1x128xf32> to vector<8x128xf32>
      %15 = arith.addf %12, %14 : vector<8x128xf32>
      %c0_12 = arith.constant 0 : index
      %c0_13 = arith.constant 0 : index
      %16 = vector.load %arg6[%c0_12, %c0_13] : memref<8x128xf32, #tpu.memory_space<vmem>>, vector<8x128xf32>
      tpu.vector_store %arg6[%c0_12, %c0_13], %15 {strides = array<i32>} : memref<8x128xf32, #tpu.memory_space<vmem>>, vector<8x128xf32>,
    } else {
    }
    return
  }
  func.func @transform_0(%arg0: i32, %arg1: i32, %arg2: i32) -> (i32, i32) {
    %c0_i32 = arith.constant 0 : i32
    return %arg0, %arg2 : i32, i32
  }
  func.func @transform_1(%arg0: i32, %arg1: i32, %arg2: i32) -> (i32, i32) {
    %c0_i32 = arith.constant 0 : i32
    return %arg2, %arg1 : i32, i32
  }
  func.func @transform_2(%arg0: i32, %arg1: i32, %arg2: i32) -> (i32, i32) {
    %c0_i32 = arith.constant 0 : i32
    %c0_i32_0 = arith.constant 0 : i32
    return %c0_i32, %arg1 : i32, i32
  }
  func.func @transform_3(%arg0: i32, %arg1: i32, %arg2: i32) -> (i32, i32) {
    %c0_i32 = arith.constant 0 : i32
    return %arg0, %arg1 : i32, i32
  }
}

</mosaic_0001>

<bundles_post_ra>
// kernel: _linear_forward.1
= control target key start
LH: loop header
LB: loop body
LE: loop exit
PB: predicated region body
PF: predicated region fallthrough
CT: control target
= control target key end

     0   :  { %8 = vsyncpa [#allocation3], 0  ;;  %s345_s0 = inlined_call_operand.vmem [shape: f32[8,128], index: 0, kind: input, shape index: {}]   ;;  %s346_s1 = inlined_call_operand.hbm [shape: f32[128,128], index: 1, kind: input, shape index: {}]   ;;  %s347_s2 = inlined_call_operand.vmem [shape: f32[1,128], index: 2, kind: input, shape index: {}]   ;;  %s348_s3 = inlined_call_operand.hbm [shape: f32[8,128], index: 3, kind: output, shape index: {}]  }
   0x1   :  { %9 = vsyncpa [#allocation4], 0  ;;  %s288_s12 = smov [#allocation2]   ;;  %s240_s16 = scalar_lea.hbm %s346_s1, 2048 }
   0x2   :  { %s17_s13 = sshll.u32 %s288_s12, 4  ;;  %p241_p0 = scmp.ne.s32.totalorder %s346_s1, %s240_s16  ;;  %s18_s13 = int_to_ptr.vmem [resolvable:$true] %s17_s13 }
   0x3   :  { %p244_p1 = scmp.lt.u32.totalorder %s240_s16, %s346_s1 }
   0x5   :  { %p246_p2 = pnand %p244_p1, %p241_p0 }
   0x7   :  { %249 = shalt.err (!%p246_p2)
}
   0x8   :  { %s250_s21 = scalar_lea.vmem %s18_s13, 2048  ;;  %p255_p4 = scmp.lt.s32.totalorder %s18_s13, %s18_s13 }
   0x9   :  { %p251_p3 = scmp.ne.s32.totalorder %s18_s13, %s250_s21  ;;  %p256_p5 = scmp.lt.s32.totalorder %s250_s21, %s250_s21 }
   0xb   :  { %p257_p6 = por %p256_p5, %p255_p4 }
   0xd   :  { %p258_p7 = pnand %p257_p6, %p251_p3 }
   0xf   :  { %261 = shalt.err (!%p258_p7)
}
  0x10   :  { %s289_s22 = smov 128   ;;  %s290_s23 = smov 8  }
  0x11   :  { %23 = dma.hbm_to_vmem [thread:$0]  %s346_s1, 2048, %s18_s13, [#allocation3], %s289_s22, %s289_s22, %s290_s23  }
  0x12   :  { %284 = dma.done.wait [#allocation3], 2048  }
  0x13   :  { %285 = vsyncadd [#allocation3], 4294965248  ;;  %v291_v0 = vmov 0.0|0.0   ;;  %vm292_vm0 = vmmov 0   ;;  %v293_v1 = vmov 0.0   ;;  %v30_v2 = vld [vmem:[#allocation2] sm:$0xff] }
  0x14   :  { %209 = vmatprep.subr.bf16.mxu0 %v291_v0  ;;  %206 = vmatprep.mubr.msk.f32.mxu0 %vm292_vm0, %v293_v1  ;;  %v31_v3 = vld [vmem:[#allocation2 + $0x8] sm:$0xff]  ;;  %v32_v4 = vld [vmem:[#allocation2 + $0x10] sm:$0xff]  ;;  %v33_v6 = vld [vmem:[#allocation2 + $0x18] sm:$0xff]  ;;  %s294_s29 = smov [#allocation5]  }
  0x15   :  { %v210_v5 = vpack.c.bf16 %v31_v3, %v30_v2  ;;  %v213_v7 = vpack.c.bf16 %v33_v6, %v32_v4  ;;  %v34_v8 = vld [vmem:[#allocation2 + $0x20] sm:$0xff]  ;;  %v35_v9 = vld [vmem:[#allocation2 + $0x28] sm:$0xff]  ;;  %v36_v11 = vld [vmem:[#allocation2 + $0x30] sm:$0xff]  ;;  %s147_s30 = sshll.u32 %s294_s29, 4  ;;  %s148_s30 = int_to_ptr.vmem [resolvable:$true] %s147_s30 }
  0x16   :  { %v216_v10 = vpack.c.bf16 %v35_v9, %v34_v8  ;;  %v37_v12 = vld [vmem:[#allocation2 + $0x38] sm:$0xff]  ;;  %v38_v14 = vld [vmem:[#allocation2 + $0x40] sm:$0xff]  ;;  %v39_v15 = vld [vmem:[#allocation2 + $0x48] sm:$0xff]  ;;  %s262_s4 = scalar_lea.vmem %s148_s30, 128  ;;  %p267_p9 = scmp.lt.s32.totalorder %s148_s30, %s148_s30 }
  0x17   :  { %211 = vmatpush3.bf16.msra.mxu0 %v210_v5  ;;  %v219_v13 = vpack.c.bf16 %v37_v12, %v36_v11  ;;  %v222_v16 = vpack.c.bf16 %v39_v15, %v38_v14  ;;  %v40_v17 = vld [vmem:[#allocation2 + $0x50] sm:$0xff]  ;;  %v41_v18 = vld [vmem:[#allocation2 + $0x58] sm:$0xff]  ;;  %v42_v20 = vld [vmem:[#allocation2 + $0x60] sm:$0xff]  ;;  %p263_p8 = scmp.ne.s32.totalorder %s148_s30, %s262_s4  ;;  %p268_p10 = scmp.lt.s32.totalorder %s262_s4, %s262_s4 }
  0x18   :  { %212 = vmatprep.subr.bf16.mxu0 %v291_v0  ;;  %v225_v19 = vpack.c.bf16 %v41_v18, %v40_v17  ;;  %v43_v21 = vld [vmem:[#allocation2 + $0x68] sm:$0xff]  ;;  %v44_v23 = vld [vmem:[#allocation2 + $0x70] sm:$0xff]  ;;  %v45_v24 = vld [vmem:[#allocation2 + $0x78] sm:$0xff] }
  0x19   :  { %v228_v22 = vpack.c.bf16 %v43_v21, %v42_v20  ;;  %v231_v25 = vpack.c.bf16 %v45_v24, %v44_v23  ;;  %v29_v26 = vld [vmem:[%s345_s0] sm:$0xff]  ;;  %p269_p11 = por %p268_p10, %p267_p9 }
  0x1a   :  { %v156_v27 = vld [vmem:[%s347_s2] ss:$0 sm:$0xff] }
  0x1b   :  { %214 = vmatpush3.bf16.msra.mxu0 %v213_v7  ;;  %p270_p12 = pnand %p269_p11, %p263_p8 }
  0x1c   :  { %215 = vmatprep.subr.bf16.mxu0 %v291_v0 }
  0x1f   :  { %217 = vmatpush3.bf16.msra.mxu0 %v216_v10 }
  0x20   :  { %218 = vmatprep.subr.bf16.mxu0 %v291_v0 }
  0x23   :  { %220 = vmatpush3.bf16.msra.mxu0 %v219_v13 }
  0x24   :  { %221 = vmatprep.subr.bf16.mxu0 %v291_v0 }
  0x27   :  { %223 = vmatpush3.bf16.msra.mxu0 %v222_v16 }
  0x28   :  { %224 = vmatprep.subr.bf16.mxu0 %v291_v0 }
  0x2b   :  { %226 = vmatpush3.bf16.msra.mxu0 %v225_v19 }
  0x2c   :  { %227 = vmatprep.subr.bf16.mxu0 %v291_v0 }
  0x2f   :  { %229 = vmatpush3.bf16.msra.mxu0 %v228_v22 }
  0x30   :  { %230 = vmatprep.subr.bf16.mxu0 %v291_v0 }
  0x33   :  { %232 = vmatpush3.bf16.msra.mxu0 %v231_v25 }
  0x36   :  { %207 = vmatmul.mubr.f32.vlgmr.msra.gmra.mrb[0].mxu0 %v29_v26 }
 0x109   :  { %v112_v28 = vpop.f32.mrb[0].mxu0 }
 0x10a   :  { %v208_v29 = vpop.f32.mrb[1].mxu0  ;;  %v139_v30 = vadd.f32 %v156_v27, %v112_v28 }
 0x10c   :  { %140 = vst [vmem:[#allocation5] sm:$0xff] %v139_v30 }
 0x10d   :  { %273 = shalt.err (!%p270_p12)
}
 0x10e   :  { %s274_s6 = scalar_lea.hbm %s348_s3, 128 }
 0x10f   :  { %p275_p13 = scmp.ne.s32.totalorder %s348_s3, %s274_s6  ;;  %p278_p0 = scmp.lt.u32.totalorder %s274_s6, %s348_s3 }
 0x111   :  { %p280_p1 = pnand %p278_p0, %p275_p13 }
 0x113   :  { %283 = shalt.err (!%p280_p1)
}
 0x114   :  { %150 = dma.vmem_to_hbm [thread:$0]  %s148_s30, 128, %s348_s3, [#allocation4]  }
 0x115   :  { %286 = dma.done.wait [#allocation4], 128  }
 0x116   :  { %287 = vsyncadd [#allocation4], 4294967168 }
 0x117   :  { %154 = vsyncpa [#allocation3], 1 }
 0x118   :  { %155 = vsyncpa [#allocation4], 1 }

</bundles_post_ra>
